<compile_context>
chip_gen: v7x
topology: tpu7x:2x2x1
jax: 0.10.0
libtpu: 0.0.40
codegen_flags: <defaults>
</compile_context>

<pallas_src>
import functools

import jax
import jax.numpy as jnp
from jax.experimental import pallas as pl
from jax.experimental.pallas import tpu as pltpu


def product_node_kernel(x_ref, wp_ref, bp_ref, o_ref, *, num_children, out_dim):
    """One fused step per batch tile: single matmul + (C-1) elementwise products."""
    # [tm, H] @ [H, C*O] -> [tm, C*O]  (MXU, f32 accumulation)
    y = jnp.dot(x_ref[...], wp_ref[...], preferred_element_type=jnp.float32)
    y = y + bp_ref[...]  # (1, C*O) broadcasts over the batch tile (VPU)

    # Running product over children: static, lane-aligned 128-wide slices.
    result = y[:, 0:out_dim]
    for c in range(1, num_children):
        result = result * y[:, c * out_dim:(c + 1) * out_dim]

    o_ref[...] = result.astype(o_ref.dtype)


def product_node_forward(x, w, b):
    """x: [B, H] f32, w: [C, H, O] f32, b: [C, O] f32 -> [B, O] f32."""
    B, H = x.shape
    C, _, O = w.shape

    # Host-side packing (one transpose/reshape): columns ordered child-major,
    # matching the in-kernel slice order.
    w_packed = jnp.transpose(w, (1, 0, 2)).reshape(H, C * O)  # [H, C*O]
    b_packed = b.reshape(1, C * O)                            # [1, C*O]

    # Batch tiling: 128 rows per MXU pass when the batch allows it, else one
    # full-array tile (block dims equal to the array dims are always legal).
    tm = 128 if (B % 128 == 0) else B
    grid = (B // tm,)

    kernel = functools.partial(
        product_node_kernel, num_children=C, out_dim=O)

    return pl.pallas_call(
        kernel,
        out_shape=jax.ShapeDtypeStruct((B, O), jnp.float32),
        grid_spec=pltpu.PrefetchScalarGridSpec(
            num_scalar_prefetch=0,
            grid=grid,
            in_specs=[
                # batch tile of activations
                pl.BlockSpec((tm, H), lambda i: (i, 0)),
                # packed weights / biases: same block for every batch tile
                pl.BlockSpec((H, C * O), lambda i: (0, 0)),
                pl.BlockSpec((1, C * O), lambda i: (0, 0)),
            ],
            out_specs=pl.BlockSpec((tm, O), lambda i: (i, 0)),
        ),
        compiler_params=pltpu.CompilerParams(
            # Pure batch parallelism: no reduction axis remains after fusion;
            # lets v7x shard batch tiles across its 2 TensorCores.
            dimension_semantics=("parallel",),
            # Tiles here are tiny; 32 MiB is safe on v5e/v6e (128 MiB VMEM)
            # and within v7x's 64 MiB.
            vmem_limit_bytes=32 * 1024 * 1024,
        ),
    )(x, w_packed, b_packed)


def product_node_reference(x, w, b):
    """Pure-JAX reference matching PyTorch ProductNode.forward semantics."""
    result = x @ w[0] + b[0]
    for c in range(1, w.shape[0]):
        result = result * (x @ w[c] + b[c])
    return result


if __name__ == "__main__":
    # Small shapes consistent with the module: C dense leaf children.
    # Batch bumped to 128 (still tiny) so the MXU M dimension is filled.
    B, H, O, C = 128, 32, 128, 3

    key = jax.random.PRNGKey(0)
    kx, kw, kb = jax.random.split(key, 3)

    x = jax.random.normal(kx, (B, H), dtype=jnp.float32)
    # Deterministic synthetic parameters (no checkpoint load).
    w = jax.random.normal(kw, (C, H, O), dtype=jnp.float32) * 0.05
    b = jax.random.normal(kb, (C, O), dtype=jnp.float32) * 0.05

    out = product_node_forward(x, w, b)
    out = jax.block_until_ready(out)

    ref = product_node_reference(x, w, b)
    assert out.shape == (B, O)
    assert jnp.allclose(out, ref, atol=1e-4, rtol=1e-4), "mismatch vs reference"

    print("KERNEL_OK")
</pallas_src>

<mosaic_0001>
module attributes {stable_mosaic.version = 11 : i64} {
  func.func @product_node_kernel(%arg0: i32, %arg1: memref<128x32xf32, #tpu.memory_space<vmem>>, %arg2: memref<32x384xf32, #tpu.memory_space<vmem>>, %arg3: memref<1x384xf32, #tpu.memory_space<vmem>>, %arg4: memref<128x128xf32, #tpu.memory_space<vmem>>) attributes {dimension_semantics = [#tpu.dimension_semantics<parallel>], iteration_bounds = array<i64: 1>, scalar_prefetch = 0 : i64, scratch_operands = 0 : i64, tpu.core_type = #tpu.core_type<tc>, window_params = [{transform_indices = @transform_0, window_bounds = array<i64: 128, 32>}, {pipeline_mode = #tpu.pipeline_mode<synchronous>, transform_indices = @transform_1, window_bounds = array<i64: 32, 384>}, {pipeline_mode = #tpu.pipeline_mode<synchronous>, transform_indices = @transform_2, window_bounds = array<i64: 1, 384>}, {transform_indices = @transform_3, window_bounds = array<i64: 128, 128>}]} {
    %c0 = arith.constant 0 : index
    %c0_0 = arith.constant 0 : index
    %0 = vector.load %arg1[%c0, %c0_0] : memref<128x32xf32, #tpu.memory_space<vmem>>, vector<128x32xf32>
    %c0_1 = arith.constant 0 : index
    %c0_2 = arith.constant 0 : index
    %1 = vector.load %arg2[%c0_1, %c0_2] : memref<32x384xf32, #tpu.memory_space<vmem>>, vector<32x384xf32>
    %cst = arith.constant dense<0.000000e+00> : vector<128x384xf32>
    %2 = tpu.matmul %0, %1, %cst {dimension_numbers = #tpu.dot_dimension_numbers<[1], [0], [0], [1], [0, 0, 1, 1], [], []>} : vector<128x32xf32>, vector<32x384xf32>, vector<128x384xf32> -> vector<128x384xf32>
    %c0_3 = arith.constant 0 : index
    %c0_4 = arith.constant 0 : index
    %3 = vector.load %arg3[%c0_3, %c0_4] : memref<1x384xf32, #tpu.memory_space<vmem>>, vector<1x384xf32>
    %4 = vector.broadcast %3 : vector<1x384xf32> to vector<128x384xf32>
    %5 = arith.addf %2, %4 : vector<128x384xf32>
    %6 = vector.extract_strided_slice %5 {offsets = [0, 0], sizes = [128, 128], strides = [1, 1]} : vector<128x384xf32> to vector<128x128xf32>
    %7 = vector.extract_strided_slice %5 {offsets = [0, 128], sizes = [128, 128], strides = [1, 1]} : vector<128x384xf32> to vector<128x128xf32>
    %8 = arith.mulf %6, %7 : vector<128x128xf32>
    %9 = vector.extract_strided_slice %5 {offsets = [0, 256], sizes = [128, 128], strides = [1, 1]} : vector<128x384xf32> to vector<128x128xf32>
    %10 = arith.mulf %8, %9 : vector<128x128xf32>
    %c0_5 = arith.constant 0 : index
    %c0_6 = arith.constant 0 : index
    %11 = vector.load %arg4[%c0_5, %c0_6] : memref<128x128xf32, #tpu.memory_space<vmem>>, vector<128x128xf32>
    tpu.vector_store %arg4[%c0_5, %c0_6], %10 {strides = array<i32>} : memref<128x128xf32, #tpu.memory_space<vmem>>, vector<128x128xf32>,
    return
  }
  func.func @transform_0(%arg0: i32) -> (i32, i32) {
    %c0_i32 = arith.constant 0 : i32
    %c0_i32_0 = arith.constant 0 : i32
    return %arg0, %c0_i32 : i32, i32
  }
  func.func @transform_1(%arg0: i32) -> (i32, i32) {
    %c0_i32 = arith.constant 0 : i32
    %c0_i32_0 = arith.constant 0 : i32
    %c0_i32_1 = arith.constant 0 : i32
    return %c0_i32, %c0_i32_0 : i32, i32
  }
  func.func @transform_2(%arg0: i32) -> (i32, i32) {
    %c0_i32 = arith.constant 0 : i32
    %c0_i32_0 = arith.constant 0 : i32
    %c0_i32_1 = arith.constant 0 : i32
    return %c0_i32, %c0_i32_0 : i32, i32
  }
  func.func @transform_3(%arg0: i32) -> (i32, i32) {
    %c0_i32 = arith.constant 0 : i32
    %c0_i32_0 = arith.constant 0 : i32
    return %arg0, %c0_i32 : i32, i32
  }
}

</mosaic_0001>

<bundles_post_ra>
// kernel: tpu_custom_call.1
= control target key start
LH: loop header
LB: loop body
LE: loop exit
PB: predicated region body
PF: predicated region fallthrough
CT: control target
= control target key end

     0   :  { %v611_v7 = vmov 0.0   ;;  %vm60_vm0 = vcmask 261120   ;;  %s848_s0 = inlined_call_operand.vmem [shape: f32[128,32], index: 0, kind: input, shape index: {}]   ;;  %s849_s1 = inlined_call_operand.vmem [shape: f32[32,384], index: 1, kind: input, shape index: {}]   ;;  %s850_s2 = inlined_call_operand.vmem [shape: f32[1,384], index: 2, kind: input, shape index: {}]   ;;  %s851_s3 = inlined_call_operand.hbm [shape: f32[128,128], index: 3, kind: output, shape index: {}]  }
   0x1   :  { %v32_v0 = vld [vmem:[%s849_s1 + $0x8] sm:$0xff]  ;;  %v35_v1 = vld [vmem:[%s849_s1 + $0x20] sm:$0xff]  ;;  %v34_v4 = vld [vmem:[%s849_s1 + $0x18] sm:$0xff]  ;;  %173 = vmatprep.mubr.f32.mxu0 %v611_v7  ;;  %245 = vmatprep.mubr.f32.mxu1 %v611_v7 }
   0x2   :  { %v31_v2 = vld [vmem:[%s849_s1] sm:$0xff]  ;;  %v563_v3 = vpack.c.bf16 %v35_v1, %v32_v0  ;;  %v38_v5 = vld [vmem:[%s849_s1 + $0x38] sm:$0xff]  ;;  %v41_v6 = vld [vmem:[%s849_s1 + $0x50] sm:$0xff] }
   0x3   :  { %v565_v8 = vpack.c.bf16 %v34_v4, %v31_v2  ;;  %v567_v9 = vpack.c.bf16 %v41_v6, %v38_v5  ;;  %v37_v10 = vld [vmem:[%s849_s1 + $0x30] sm:$0xff]  ;;  %v40_v11 = vld [vmem:[%s849_s1 + $0x48] sm:$0xff]  ;;  %v39_v16 = vld [vmem:[%s849_s1 + $0x40] sm:$0xff] }
   0x4   :  { %564 = vmatprep.subr.bf16.mxu0 %v563_v3  ;;  %579 = vmatprep.subr.bf16.mxu1 %v563_v3  ;;  %v33_v12 = vld [vmem:[%s849_s1 + $0x10] sm:$0xff]  ;;  %v36_v13 = vld [vmem:[%s849_s1 + $0x28] sm:$0xff]  ;;  %v569_v14 = vpack.c.bf16 %v40_v11, %v37_v10  ;;  %v42_v17 = vld [vmem:[%s849_s1 + $0x58] sm:$0xff] }
   0x5   :  { %566 = vmatpush1.bf16.msra.mxu0 %v565_v8  ;;  %581 = vmatpush1.bf16.msra.mxu1 %v565_v8  ;;  %v571_v15 = vpack.c.bf16 %v36_v13, %v33_v12  ;;  %v15_v18 = vld [vmem:[%s848_s0] sm:$0xff]  ;;  %v575_v20 = vpack.c.bf16 %v42_v17, %v39_v16 }
   0x6   :  { %568 = vmatprep.subr.bf16.mxu0 %v567_v9  ;;  %580 = vmatprep.subr.bf16.mxu1 %v567_v9  ;;  %v27_v19 = vld [vmem:[%s848_s0 + $0x60] sm:$0xff] }
   0x9   :  { %570 = vmatpush1.bf16.msra.mxu0 %v569_v14  ;;  %582 = vmatpush1.bf16.msra.mxu1 %v569_v14 }
   0xa   :  { %572 = vmatprep.subr.bf16.mxu1 %v571_v15 }
   0xb   :  { %8 = vsyncpa [#allocation3], 0  ;;  %v16_v21 = vld [vmem:[%s848_s0 + $0x8] sm:$0xff]  ;;  %v17_v23 = vld [vmem:[%s848_s0 + $0x10] sm:$0xff]  ;;  %v45_v35 = vlaneseq }
   0xc   :  { %479 = vmatmul.mubr.msk.f32.vlgmr.msra.gmra.mrb[0].mxu0 %vm60_vm0, %v15_v18  ;;  %491 = vmatmul.mubr.msk.f32.vlgmr.msra.gmra.mrb[0].mxu1 %vm60_vm0, %v27_v19  ;;  %v28_v22 = vld [vmem:[%s848_s0 + $0x68] sm:$0xff]  ;;  %v29_v24 = vld [vmem:[%s848_s0 + $0x70] sm:$0xff]  ;;  %v18_v25 = vld [vmem:[%s848_s0 + $0x18] sm:$0xff] }
   0xd   :  { %574 = vmatpush3.bf16.msra.mxu1 %v571_v15  ;;  %179 = vmatprep.mubr.f32.mxu0 %v611_v7  ;;  %v30_v26 = vld [vmem:[%s848_s0 + $0x78] sm:$0xff]  ;;  %v19_v27 = vld [vmem:[%s848_s0 + $0x20] sm:$0xff]  ;;  %v20_v28 = vld [vmem:[%s848_s0 + $0x28] sm:$0xff]  ;;  %v46_v36 = vshrl.u32 %v45_v35, 7 }
   0xe   :  { %251 = vmatprep.mubr.f32.mxu1 %v611_v7  ;;  %576 = vmatprep.subr.bf16.mxu1 %v575_v20  ;;  %v21_v29 = vld [vmem:[%s848_s0 + $0x30] sm:$0xff]  ;;  %v22_v30 = vld [vmem:[%s848_s0 + $0x38] sm:$0xff]  ;;  %v23_v31 = vld [vmem:[%s848_s0 + $0x40] sm:$0xff] }
   0xf   :  { %v24_v32 = vld [vmem:[%s848_s0 + $0x48] sm:$0xff]  ;;  %v25_v33 = vld [vmem:[%s848_s0 + $0x50] sm:$0xff]  ;;  %v26_v34 = vld [vmem:[%s848_s0 + $0x58] sm:$0xff]  ;;  %v47_v37 = vsub.s32 0, %v46_v36  ;;  %v51_v39 = vsub.s32 1, %v46_v36  ;;  %v55_v4 = vsub.s32 2, %v46_v36 }
  0x10   :  { %480 = vmatmul.mubr.msk.f32.gmra.mrb[2].mxu0 %vm60_vm0, %v16_v21  ;;  %492 = vmatmul.mubr.msk.f32.gmra.mrb[2].mxu1 %vm60_vm0, %v28_v22  ;;  %v43_v38 = vld [vmem:[%s850_s2] sm:$0x7]  ;;  %s612_s2 = smov [#allocation2]  }
  0x11   :  { %185 = vmatprep.mubr.f32.mxu0 %v611_v7  ;;  %257 = vmatprep.mubr.f32.mxu1 %v611_v7  ;;  %v770_v40 = vrot.slane %v43_v38, %v47_v37  ;;  %v772_v41 = vrot.slane %v43_v38, %v51_v39  ;;  %v794_v15 = vrot.slane %v43_v38, %v55_v4  ;;  %s468_s13 = sshll.u32 %s612_s2, 4  ;;  %s469_s13 = int_to_ptr.vmem [resolvable:$true] %s468_s13 }
  0x12   :  { %578 = vmatpush3.bf16.msra.mxu1 %v575_v20  ;;  %s587_s14 = scalar_lea.vmem %s469_s13, 2048  ;;  %p592_p1 = scmp.lt.s32.totalorder %s469_s13, %s469_s13 }
  0x13   :  { %p588_p0 = scmp.ne.s32.totalorder %s469_s13, %s587_s14  ;;  %p593_p2 = scmp.lt.s32.totalorder %s587_s14, %s587_s14 }
  0x14   :  { %481 = vmatmul.mubr.msk.f32.gmra.mrb[4].mxu0 %vm60_vm0, %v17_v23  ;;  %493 = vmatmul.mubr.msk.f32.gmra.mrb[4].mxu1 %vm60_vm0, %v29_v24 }
  0x15   :  { %191 = vmatprep.mubr.f32.mxu0 %v611_v7  ;;  %263 = vmatprep.mubr.f32.mxu1 %v611_v7  ;;  %p594_p3 = por %p593_p2, %p592_p1 }
  0x17   :  { %p595_p4 = pnand %p594_p3, %p588_p0 }
  0x18   :  { %482 = vmatmul.mubr.msk.f32.gmra.mrb[6].mxu0 %vm60_vm0, %v18_v25  ;;  %494 = vmatmul.mubr.msk.f32.gmra.mrb[6].mxu1 %vm60_vm0, %v30_v26 }
  0x19   :  { %197 = vmatprep.mubr.f32.mxu0 %v611_v7  ;;  %539 = vmatprep.mubr.msk.f32.mxu1 %vm60_vm0, %v15_v18 }
  0x1c   :  { %483 = vmatmul.mubr.msk.f32.gmra.mrb[8].mxu0 %vm60_vm0, %v19_v27  ;;  %540 = vmatmul.mubr.msk.f32.vlgmr.msra.gmra.mrb[8].mxu1 %vm60_vm0, %v16_v21 }
  0x1d   :  { %203 = vmatprep.mubr.f32.mxu0 %v611_v7  ;;  %542 = vmatprep.mubr.msk.f32.mxu1 %vm60_vm0, %v17_v23 }
  0x20   :  { %484 = vmatmul.mubr.msk.f32.gmra.mrb[10].mxu0 %vm60_vm0, %v20_v28  ;;  %543 = vmatmul.mubr.msk.f32.gmra.mrb[10].mxu1 %vm60_vm0, %v18_v25 }
  0x21   :  { %209 = vmatprep.mubr.f32.mxu0 %v611_v7  ;;  %545 = vmatprep.mubr.msk.f32.mxu1 %vm60_vm0, %v19_v27 }
  0x24   :  { %485 = vmatmul.mubr.msk.f32.gmra.mrb[12].mxu0 %vm60_vm0, %v21_v29  ;;  %546 = vmatmul.mubr.msk.f32.gmra.mrb[12].mxu1 %vm60_vm0, %v20_v28 }
  0x25   :  { %215 = vmatprep.mubr.f32.mxu0 %v611_v7  ;;  %548 = vmatprep.mubr.msk.f32.mxu1 %vm60_vm0, %v21_v29 }
  0x28   :  { %486 = vmatmul.mubr.msk.f32.gmra.mrb[14].mxu0 %vm60_vm0, %v22_v30  ;;  %549 = vmatmul.mubr.msk.f32.gmra.mrb[14].mxu1 %vm60_vm0, %v22_v30 }
  0x29   :  { %221 = vmatprep.mubr.f32.mxu0 %v611_v7  ;;  %551 = vmatprep.mubr.msk.f32.mxu1 %vm60_vm0, %v23_v31 }
  0x2c   :  { %487 = vmatmul.mubr.msk.f32.gmra.mrb[16].mxu0 %vm60_vm0, %v23_v31  ;;  %552 = vmatmul.mubr.msk.f32.gmra.mrb[16].mxu1 %vm60_vm0, %v24_v32 }
  0x2d   :  { %227 = vmatprep.mubr.f32.mxu0 %v611_v7  ;;  %554 = vmatprep.mubr.msk.f32.mxu1 %vm60_vm0, %v25_v33 }
  0x30   :  { %488 = vmatmul.mubr.msk.f32.gmra.mrb[18].mxu0 %vm60_vm0, %v24_v32  ;;  %555 = vmatmul.mubr.msk.f32.gmra.mrb[18].mxu1 %vm60_vm0, %v26_v34 }
  0x31   :  { %233 = vmatprep.mubr.f32.mxu0 %v611_v7  ;;  %557 = vmatprep.mubr.msk.f32.mxu1 %vm60_vm0, %v27_v19 }
  0x34   :  { %489 = vmatmul.mubr.msk.f32.gmra.mrb[20].mxu0 %vm60_vm0, %v25_v33  ;;  %558 = vmatmul.mubr.msk.f32.gmra.mrb[20].mxu1 %vm60_vm0, %v28_v22 }
  0x35   :  { %239 = vmatprep.mubr.f32.mxu0 %v611_v7  ;;  %560 = vmatprep.mubr.msk.f32.mxu1 %vm60_vm0, %v29_v24 }
  0x38   :  { %490 = vmatmul.mubr.msk.f32.gmra.mrb[22].mxu0 %vm60_vm0, %v26_v34  ;;  %561 = vmatmul.mubr.msk.f32.gmra.mrb[22].mxu1 %vm60_vm0, %v30_v26 }
  0xdf   :  { %v175_v42 = vpop.f32.mrb[0].mxu0  ;;  %v247_v43 = vpop.f32.mrb[0].mxu1 }
  0xe0   :  { %v176_v44 = vadd.f32 %v175_v42, %v770_v40  ;;  %v177_v45 = vpop.f32.mrb[1].mxu0  ;;  %v248_v46 = vadd.f32 %v247_v43, %v770_v40  ;;  %v249_v47 = vpop.f32.mrb[1].mxu1 }
  0xe1   :  { %v178_v48 = vadd.f32 %v177_v45, %v772_v41  ;;  %v250_v49 = vadd.f32 %v249_v47, %v772_v41 }
  0xe3   :  { %v415_v50 = vmul.f32 %v178_v48, %v176_v44  ;;  %v778_v51 = vmul.f32 %v250_v49, %v248_v46  ;;  %v181_v52 = vpop.f32.mrb[2].mxu0  ;;  %v253_v53 = vpop.f32.mrb[2].mxu1 }
  0xe4   :  { %v182_v54 = vadd.f32 %v181_v52, %v770_v40  ;;  %v183_v55 = vpop.f32.mrb[3].mxu0  ;;  %v254_v56 = vadd.f32 %v253_v53, %v770_v40  ;;  %v255_v57 = vpop.f32.mrb[3].mxu1 }
  0xe5   :  { %v184_v58 = vadd.f32 %v183_v55, %v772_v41  ;;  %v256_v59 = vadd.f32 %v255_v57, %v772_v41 }
  0xe7   :  { %v416_v60 = vmul.f32 %v184_v58, %v182_v54  ;;  %v784_v61 = vmul.f32 %v256_v59, %v254_v56  ;;  %v187_v62 = vpop.f32.mrb[4].mxu0  ;;  %v259_v63 = vpop.f32.mrb[4].mxu1 }
  0xe8   :  { %v188_v0 = vadd.f32 %v187_v62, %v770_v40  ;;  %v189_v1 = vpop.f32.mrb[5].mxu0  ;;  %v260_v2 = vadd.f32 %v259_v63, %v770_v40  ;;  %v261_v3 = vpop.f32.mrb[5].mxu1 }
  0xe9   :  { %v190_v5 = vadd.f32 %v189_v1, %v772_v41  ;;  %v262_v6 = vadd.f32 %v261_v3, %v772_v41 }
  0xeb   :  { %v417_v7 = vmul.f32 %v190_v5, %v188_v0  ;;  %v790_v8 = vmul.f32 %v262_v6, %v260_v2  ;;  %v193_v9 = vpop.f32.mrb[6].mxu0  ;;  %v265_v10 = vpop.f32.mrb[6].mxu1 }
  0xec   :  { %v194_v11 = vadd.f32 %v193_v9, %v770_v40  ;;  %v195_v12 = vpop.f32.mrb[7].mxu0  ;;  %v266_v13 = vadd.f32 %v265_v10, %v770_v40  ;;  %v267_v14 = vpop.f32.mrb[7].mxu1 }
  0xed   :  { %v196_v16 = vadd.f32 %v195_v12, %v772_v41  ;;  %v268_v17 = vadd.f32 %v267_v14, %v772_v41 }
  0xef   :  { %v418_v18 = vmul.f32 %v196_v16, %v194_v11  ;;  %v798_v19 = vmul.f32 %v268_v17, %v266_v13  ;;  %v199_v20 = vpop.f32.mrb[8].mxu0  ;;  %v541_v21 = vpop.f32.mrb[8].mxu1 }
  0xf0   :  { %v200_v22 = vadd.f32 %v199_v20, %v770_v40  ;;  %v342_v23 = vadd.f32 %v541_v21, %v794_v15  ;;  %v201_v24 = vpop.f32.mrb[9].mxu0  ;;  %v336_v25 = vpop.f32.mrb[9].mxu1 }
  0xf1   :  { %v202_v26 = vadd.f32 %v201_v24, %v772_v41  ;;  %v337_v27 = vadd.f32 %v336_v25, %v794_v15 }
  0xf2   :  { %v432_v28 = vmul.f32 %v416_v60, %v342_v23 }
  0xf3   :  { %v419_v29 = vmul.f32 %v202_v26, %v200_v22  ;;  %v431_v30 = vmul.f32 %v415_v50, %v337_v27  ;;  %v205_v31 = vpop.f32.mrb[10].mxu0  ;;  %v544_v32 = vpop.f32.mrb[10].mxu1 }
  0xf4   :  { %448 = vst [vmem:[#allocation2 + $0x8] sm:$0xff] %v432_v28  ;;  %v206_v33 = vadd.f32 %v205_v31, %v770_v40  ;;  %v352_v34 = vadd.f32 %v544_v32, %v794_v15  ;;  %v207_v35 = vpop.f32.mrb[11].mxu0  ;;  %v346_v36 = vpop.f32.mrb[11].mxu1 }
  0xf5   :  { %447 = vst [vmem:[#allocation2] sm:$0xff] %v431_v30  ;;  %v208_v37 = vadd.f32 %v207_v35, %v772_v41  ;;  %v347_v38 = vadd.f32 %v346_v36, %v794_v15 }
  0xf6   :  { %v434_v39 = vmul.f32 %v418_v18, %v352_v34 }
  0xf7   :  { %v420_v42 = vmul.f32 %v208_v37, %v206_v33  ;;  %v433_v43 = vmul.f32 %v417_v7, %v347_v38  ;;  %v211_v44 = vpop.f32.mrb[12].mxu0  ;;  %v547_v45 = vpop.f32.mrb[12].mxu1 }
  0xf8   :  { %450 = vst [vmem:[#allocation2 + $0x18] sm:$0xff] %v434_v39  ;;  %v212_v46 = vadd.f32 %v211_v44, %v770_v40  ;;  %v362_v47 = vadd.f32 %v547_v45, %v794_v15  ;;  %v213_v48 = vpop.f32.mrb[13].mxu0  ;;  %v356_v49 = vpop.f32.mrb[13].mxu1 }
  0xf9   :  { %449 = vst [vmem:[#allocation2 + $0x10] sm:$0xff] %v433_v43  ;;  %v214_v50 = vadd.f32 %v213_v48, %v772_v41  ;;  %v357_v52 = vadd.f32 %v356_v49, %v794_v15 }
  0xfa   :  { %v436_v53 = vmul.f32 %v420_v42, %v362_v47 }
  0xfb   :  { %v421_v54 = vmul.f32 %v214_v50, %v212_v46  ;;  %v435_v55 = vmul.f32 %v419_v29, %v357_v52  ;;  %v217_v56 = vpop.f32.mrb[14].mxu0  ;;  %v550_v57 = vpop.f32.mrb[14].mxu1 }
  0xfc   :  { %452 = vst [vmem:[#allocation2 + $0x28] sm:$0xff] %v436_v53  ;;  %v218_v58 = vadd.f32 %v217_v56, %v770_v40  ;;  %v219_v59 = vpop.f32.mrb[15].mxu0  ;;  %v366_v60 = vpop.f32.mrb[15].mxu1  ;;  %v372_v62 = vadd.f32 %v550_v57, %v794_v15 }
  0xfd   :  { %451 = vst [vmem:[#allocation2 + $0x20] sm:$0xff] %v435_v55  ;;  %v220_v63 = vadd.f32 %v219_v59, %v772_v41  ;;  %v367_v0 = vadd.f32 %v366_v60, %v794_v15 }
  0xff   :  { %v422_v1 = vmul.f32 %v220_v63, %v218_v58  ;;  %v437_v2 = vmul.f32 %v421_v54, %v367_v0  ;;  %v223_v3 = vpop.f32.mrb[16].mxu0  ;;  %v553_v4 = vpop.f32.mrb[16].mxu1 }
 0x100   :  { %v224_v5 = vadd.f32 %v223_v3, %v770_v40  ;;  %v225_v6 = vpop.f32.mrb[17].mxu0  ;;  %v376_v7 = vpop.f32.mrb[17].mxu1  ;;  %v382_v22 = vadd.f32 %v553_v4, %v794_v15 }
 0x101   :  { %v438_v9 = vmul.f32 %v422_v1, %v372_v62  ;;  %453 = vst [vmem:[#allocation2 + $0x30] sm:$0xff] %v437_v2  ;;  %v226_v10 = vadd.f32 %v225_v6, %v772_v41  ;;  %v377_v11 = vadd.f32 %v376_v7, %v794_v15 }
 0x103   :  { %454 = vst [vmem:[#allocation2 + $0x38] sm:$0xff] %v438_v9  ;;  %v423_v12 = vmul.f32 %v226_v10, %v224_v5  ;;  %v229_v13 = vpop.f32.mrb[18].mxu0  ;;  %v556_v14 = vpop.f32.mrb[18].mxu1 }
 0x104   :  { %v230_v16 = vadd.f32 %v229_v13, %v770_v40  ;;  %v231_v17 = vpop.f32.mrb[19].mxu0  ;;  %v386_v18 = vpop.f32.mrb[19].mxu1 }
 0x105   :  { %v439_v20 = vmul.f32 %v423_v12, %v377_v11  ;;  %v232_v21 = vadd.f32 %v231_v17, %v772_v41  ;;  %v387_v34 = vadd.f32 %v386_v18, %v794_v15 }
 0x107   :  { %455 = vst [vmem:[#allocation2 + $0x40] sm:$0xff] %v439_v20  ;;  %v424_v23 = vmul.f32 %v232_v21, %v230_v16  ;;  %v235_v24 = vpop.f32.mrb[20].mxu0  ;;  %v559_v25 = vpop.f32.mrb[20].mxu1 }
 0x108   :  { %v236_v26 = vadd.f32 %v235_v24, %v770_v40  ;;  %v402_v27 = vadd.f32 %v559_v25, %v794_v15  ;;  %v237_v28 = vpop.f32.mrb[21].mxu0  ;;  %v396_v29 = vpop.f32.mrb[21].mxu1 }
 0x109   :  { %v440_v30 = vmul.f32 %v424_v23, %v382_v22  ;;  %v238_v31 = vadd.f32 %v237_v28, %v772_v41  ;;  %v397_v32 = vadd.f32 %v396_v29, %v794_v15 }
 0x10a   :  { %v444_v33 = vmul.f32 %v784_v61, %v402_v27 }
 0x10b   :  { %456 = vst [vmem:[#allocation2 + $0x48] sm:$0xff] %v440_v30  ;;  %v425_v35 = vmul.f32 %v238_v31, %v236_v26  ;;  %v443_v36 = vmul.f32 %v778_v51, %v397_v32  ;;  %v241_v37 = vpop.f32.mrb[22].mxu0  ;;  %v562_v38 = vpop.f32.mrb[22].mxu1  ;;  %v392_v51 = vadd.f32 %v556_v14, %v794_v15 }
 0x10c   :  { %460 = vst [vmem:[#allocation2 + $0x68] sm:$0xff] %v444_v33  ;;  %v242_v39 = vadd.f32 %v241_v37, %v770_v40  ;;  %v412_v42 = vadd.f32 %v562_v38, %v794_v15  ;;  %v243_v43 = vpop.f32.mrb[23].mxu0  ;;  %v406_v44 = vpop.f32.mrb[23].mxu1 }
 0x10d   :  { %v441_v45 = vmul.f32 %v425_v35, %v387_v34  ;;  %459 = vst [vmem:[#allocation2 + $0x60] sm:$0xff] %v443_v36  ;;  %v244_v46 = vadd.f32 %v243_v43, %v772_v41  ;;  %v407_v61 = vadd.f32 %v406_v44, %v794_v15 }
 0x10e   :  { %v446_v47 = vmul.f32 %v798_v19, %v412_v42 }
 0x10f   :  { %457 = vst [vmem:[#allocation2 + $0x50] sm:$0xff] %v441_v45  ;;  %v426_v48 = vmul.f32 %v244_v46, %v242_v39  ;;  %v445_v40 = vmul.f32 %v790_v8, %v407_v61 }
 0x110   :  { %462 = vst [vmem:[#allocation2 + $0x78] sm:$0xff] %v446_v47 }
 0x111   :  { %v442_v49 = vmul.f32 %v426_v48, %v392_v51  ;;  %461 = vst [vmem:[#allocation2 + $0x70] sm:$0xff] %v445_v40 }
 0x113   :  { %458 = vst [vmem:[#allocation2 + $0x58] sm:$0xff] %v442_v49 }
 0x114   :  { %598 = shalt.err (!%p595_p4)
}
 0x115   :  { %s599_s17 = scalar_lea.hbm %s851_s3, 2048 }
 0x116   :  { %p600_p5 = scmp.ne.s32.totalorder %s851_s3, %s599_s17  ;;  %p603_p6 = scmp.lt.u32.totalorder %s599_s17, %s851_s3 }
 0x118   :  { %p605_p7 = pnand %p603_p6, %p600_p5 }
 0x11a   :  { %608 = shalt.err (!%p605_p7)
}
 0x11b   :  { %s613_s22 = smov 128   ;;  %s614_s23 = smov 8  }
 0x11c   :  { %474 = dma.vmem_to_hbm [thread:$0]  %s469_s13, 2048, %s851_s3, [#allocation3], %s613_s22, %s613_s22, %s614_s23  }
 0x11d   :  { %609 = dma.done.wait [#allocation3], 2048  }
 0x11e   :  { %610 = vsyncadd [#allocation3], 4294965248 }
 0x11f   :  { %478 = vsyncpa [#allocation3], 1 }

</bundles_post_ra>
